<compile_context>
chip_gen: v7x
topology: tpu7x:2x2x1
jax: 0.10.0
libtpu: 0.0.40
codegen_flags: <defaults>
</compile_context>

<pallas_src>
import functools
import math

import jax
import jax.numpy as jnp
from jax.experimental import pallas as pl
from jax.experimental.pallas import tpu as pltpu

TWO_PI = 2.0 * math.pi


def _softshrink(x, lambd=0.5):
    return jnp.where(x > lambd, x - lambd, jnp.where(x < -lambd, x + lambd, 0.0))


_ACTIVATIONS = {
    "identity": lambda x: x,
    "relu": lambda x: jnp.maximum(x, 0.0),
    # RReLU eval mode: fixed slope (lower+upper)/2 with torch defaults 1/8, 1/3.
    "rrelu": lambda x: jnp.where(x >= 0, x, x * ((1.0 / 8.0 + 1.0 / 3.0) / 2.0)),
    "tanh": jnp.tanh,
    "sigmoid": jax.nn.sigmoid,
    "gelu": jax.nn.gelu,
    "selu": jax.nn.selu,
    "softplus": jax.nn.softplus,
    "softshrink": _softshrink,
    "sin": lambda x: jnp.sin(TWO_PI * x),   # Sine module
    "exp": jnp.exp,                          # Expon module (final_transform='exp')
}
_TRANSCENDENTAL = frozenset(
    {"tanh", "sigmoid", "gelu", "selu", "softplus", "sin", "exp"})


# --------------------------------------------------------------------------
# Kernel: whole MLP fused, transposed layout (batch on the lane axis).
# --------------------------------------------------------------------------
def _mlp_kernel(*refs, n_layers, act_names):
    """refs = (xT_ref (indim, tm),
               w0T_ref (h0, indim), b0_ref (h0, 1), ...,
               oT_ref (outdim, tm))."""
    xT_ref = refs[0]
    oT_ref = refs[-1]
    h = xT_ref[...].astype(jnp.float32)               # (K0, tm), tm on lanes
    for layer in range(n_layers):
        wT = refs[1 + 2 * layer][...]                 # (M, K) f32, VMEM-resident
        b = refs[2 + 2 * layer][...]                  # (M, 1) f32, lane-broadcast
        # h^T_{l+1} = W_l^T . h^T_l : batch tile (>=128) is the MXU N/lane axis.
        h = jnp.dot(wT, h, preferred_element_type=jnp.float32) + b
        h = _ACTIVATIONS[act_names[layer]](h)
    oT_ref[...] = h.astype(oT_ref.dtype)


# --------------------------------------------------------------------------
# Tiling / VMEM budgeting helpers.
# --------------------------------------------------------------------------
def _round_up(x, m):
    return ((x + m - 1) // m) * m


def _vmem_limit_bytes():
    """Explicit scoped-VMEM limit.  Default scoped limits are only 16/32/32 MiB
    on v5e/v6e/v7x while physical VMEM is 128/128/64 MiB; raise the limit but
    keep generous headroom for compiler scratch."""
    phys = 64 << 20                                    # conservative (v7x per-TC)
    try:
        phys = int(getattr(pltpu.get_tpu_info(), "vmem_capacity_bytes", phys))
    except Exception:
        pass
    return max(32 << 20, min(phys - (16 << 20), 64 << 20))


def _pick_batch_tile(n, bytes_per_row, budget_bytes, lane=128, max_rows=32768):
    """Pick the batch tile tm (lane axis of every block).  Returns (tm, n_pad).

    tm is a multiple of 128 (lane quantum, covers every dtype's packing)
    unless the whole batch fits a single small full-extent block.  Keeps
    >= 2 grid steps whenever the batch allows it (v7x megacore)."""
    cap = budget_bytes // max(bytes_per_row, 1)
    cap = min(max(lane, (cap // lane) * lane), max_rows)
    if n <= min(cap, 2 * lane):
        return n, n                                    # one full-extent block, no pad
    n128 = _round_up(n, lane)
    min_steps = 2 if n >= 2 * lane else 1
    steps = max(min_steps, -(-n128 // cap))
    tm = min(cap, _round_up(-(-n // steps), lane))
    n_pad = _round_up(n, tm)
    return tm, n_pad


# --------------------------------------------------------------------------
# Wrapper.
# --------------------------------------------------------------------------
def mlp_forward(x, params, act_names):
    """Fused MLP forward in a single pallas_call.

    params: per layer (wT: (M, K) f32 — PyTorch (out, in) layout, exactly
    what the transposed kernel consumes — and b: (M, 1) f32).  Weights and
    biases stay resident in VMEM; x^T / out^T are streamed over a 1-D
    'parallel' grid over batch tiles, so intermediate activations never
    touch HBM."""
    n, indim = x.shape
    n_layers = len(params)
    assert len(act_names) == n_layers
    dtype = x.dtype
    itemsize = jnp.dtype(dtype).itemsize
    outdim = params[-1][0].shape[0]
    max_width = max([indim] + [wT.shape[0] for wT, _ in params])

    # ---- VMEM budget -> batch tile --------------------------------------
    resident = sum(int(wT.size + b.size) * 4 for wT, b in params)   # f32 weights
    vmem_limit = _vmem_limit_bytes()
    bytes_per_row = (2 * indim * itemsize          # x^T block, double-buffered
                     + 2 * outdim * itemsize       # out^T block, double-buffered
                     + 2 * max_width * 4)          # f32 intermediate h (live pair)
    budget = max(1 << 20, vmem_limit - 2 * resident - (4 << 20))
    tm, n_pad = _pick_batch_tile(n, bytes_per_row, budget)
    grid = (n_pad // tm,)

    # ---- wrapper-side transpose (+ zero pad) so batch lands on lanes -----
    xT = x.T
    if n_pad != n:
        xT = jnp.pad(xT, ((0, 0), (0, n_pad - n)))

    args = [xT]
    flops = 0
    trans = 0
    bytes_accessed = (n_pad * indim + n_pad * outdim) * itemsize
    for (wT, b), act in zip(params, act_names):
        m, k = wT.shape
        args.extend([wT, b])
        flops += 2 * n_pad * k * m + n_pad * m
        if act in _TRANSCENDENTAL:
            trans += n_pad * m
        bytes_accessed += (m * k + m) * 4

    def build_specs(single_buffer_weights):
        specs = [pl.BlockSpec((indim, tm), lambda i: (0, i))]
        for wT, _ in params:
            m, k = wT.shape
            if single_buffer_weights:
                # Constant index map -> no second pipeline buffer needed.
                specs.append(pl.BlockSpec((m, k), lambda i: (0, 0),
                                          pipeline_mode=pl.Buffered(1)))
                specs.append(pl.BlockSpec((m, 1), lambda i: (0, 0),
                                          pipeline_mode=pl.Buffered(1)))
            else:
                specs.append(pl.BlockSpec((m, k), lambda i: (0, 0)))
                specs.append(pl.BlockSpec((m, 1), lambda i: (0, 0)))
        return specs

    kernel = functools.partial(_mlp_kernel, n_layers=n_layers,
                               act_names=tuple(act_names))

    def run(single_buffer_weights):
        return pl.pallas_call(
            kernel,
            out_shape=jax.ShapeDtypeStruct((outdim, n_pad), dtype),
            grid_spec=pltpu.PrefetchScalarGridSpec(
                num_scalar_prefetch=0,
                grid=grid,
                in_specs=build_specs(single_buffer_weights),
                out_specs=pl.BlockSpec((outdim, tm), lambda i: (0, i)),
            ),
            compiler_params=pltpu.CompilerParams(
                dimension_semantics=("parallel",),
                vmem_limit_bytes=vmem_limit),
            cost_estimate=pl.CostEstimate(
                flops=flops, transcendentals=trans,
                bytes_accessed=bytes_accessed),
        )(*args)

    try:
        outT = run(True)      # single-buffered resident weights (VMEM headroom)
    except Exception:         # fallback if pipeline_mode=Buffered(1) unsupported
        outT = run(False)

    return outT[:, :n].T


class MLP:
    """JAX/Pallas port of the forward pass of the PyTorch MLP module."""

    def __init__(self, indim, outdim, hls, biasorno=True, activ="relu",
                 bnorm=False, bnlearn=True, dropout=0.0, final_transform=None,
                 *, key):
        assert len(hls) > 0
        if bnorm:
            # TODO(synk): BatchNorm1d (running stats / affine) not implemented in the Pallas port.
            raise NotImplementedError("bnorm=True is not supported")
        self.indim, self.outdim, self.hls = indim, outdim, tuple(hls)
        self.activ = activ if activ in _ACTIVATIONS else "identity"
        self.final_transform = final_transform
        self.dropout = dropout  # inference (eval mode): dropout is identity
        dims = (indim,) + self.hls + (outdim,)
        self.params = []
        for i in range(len(dims) - 1):
            key, kw, kb = jax.random.split(key, 3)
            bound = 1.0 / math.sqrt(dims[i])            # torch.nn.Linear default init
            # PyTorch (out_features, in_features) layout: exactly what the
            # transposed kernel consumes -> no per-call weight transpose/cast,
            # and weights stay full f32 precision regardless of x.dtype.
            wT = jax.random.uniform(kw, (dims[i + 1], dims[i]), jnp.float32,
                                    minval=-bound, maxval=bound)
            if biasorno:
                b = jax.random.uniform(kb, (dims[i + 1],), jnp.float32,
                                       minval=-bound, maxval=bound)
            else:
                b = jnp.zeros((dims[i + 1],), jnp.float32)
            self.params.append((wT, jnp.reshape(b, (dims[i + 1], 1))))
        # torch Sequential: Linear0, [activ, Linear_i]..., [activ, Linear_final], (Expon)
        # -> activation applied after every hidden Linear; final Linear gets exp/identity.
        self.act_names = [self.activ] * len(self.hls) + (
            ["exp"] if final_transform == "exp" else ["identity"])

    def __call__(self, x):
        return mlp_forward(x, self.params, self.act_names)


def mlp_reference(x, params, act_names):
    """Pure-JAX reference of the same forward pass (row-major layout)."""
    h = x.astype(jnp.float32)
    for (wT, b), act in zip(params, act_names):
        h = jnp.dot(h, wT.T) + b[:, 0]
        h = _ACTIVATIONS[act](h)
    return h.astype(x.dtype)


if __name__ == "__main__":
    key = jax.random.PRNGKey(0)
    k_x1, k_x2, k_p1, k_p2 = jax.random.split(key, 4)

    indim, outdim = 8, 4
    hls = (32, 32)

    # Default configuration: relu activation, bias, no final transform.
    # (Small batch -> single full-extent block path.)
    batch = 64
    x = jax.random.normal(k_x1, (batch, indim), dtype=jnp.float32)
    model_relu = MLP(indim, outdim, hls, biasorno=True, activ="relu", key=k_p1)
    y = jax.block_until_ready(model_relu(x))
    ref = mlp_reference(x, model_relu.params, model_relu.act_names)
    assert y.shape == (batch, outdim) and y.dtype == x.dtype
    # Kernel matmuls run at default MXU precision (not HIGHEST) per perf
    # guidance, so compare loosely against the pure-JAX reference.
    assert jnp.allclose(y, ref, atol=5e-2, rtol=5e-2), \
        float(jnp.max(jnp.abs(y - ref)))

    # Sine activation + exponential final transform (Sine / Expon modules).
    # Awkward batch size exercises the lane-tiled, padded multi-step grid.
    batch2 = 300
    x2 = jax.random.normal(k_x2, (batch2, indim), dtype=jnp.float32)
    model_sin = MLP(indim, outdim, hls, biasorno=True, activ="sin",
                    final_transform="exp", key=k_p2)
    y2 = jax.block_until_ready(model_sin(x2))
    ref2 = mlp_reference(x2, model_sin.params, model_sin.act_names)
    assert y2.shape == (batch2, outdim) and y2.dtype == x2.dtype
    assert jnp.allclose(y2, ref2, atol=5e-2, rtol=5e-2), \
        float(jnp.max(jnp.abs(y2 - ref2)))

    print("KERNEL_OK")
</pallas_src>

<mosaic_0001>
module attributes {stable_mosaic.version = 11 : i64} {
  func.func @_mlp_kernel(%arg0: i32, %arg1: memref<8x64xf32, #tpu.memory_space<vmem>>, %arg2: memref<32x8xf32, #tpu.memory_space<vmem>>, %arg3: memref<32x1xf32, #tpu.memory_space<vmem>>, %arg4: memref<32x32xf32, #tpu.memory_space<vmem>>, %arg5: memref<32x1xf32, #tpu.memory_space<vmem>>, %arg6: memref<4x32xf32, #tpu.memory_space<vmem>>, %arg7: memref<4x1xf32, #tpu.memory_space<vmem>>, %arg8: memref<4x64xf32, #tpu.memory_space<vmem>>) attributes {dimension_semantics = [#tpu.dimension_semantics<parallel>], iteration_bounds = array<i64: 1>, scalar_prefetch = 0 : i64, scratch_operands = 0 : i64, tpu.core_type = #tpu.core_type<tc>, window_params = [{transform_indices = @transform_0, window_bounds = array<i64: 8, 64>}, {pipeline_mode = #tpu.pipeline_mode<synchronous>, transform_indices = @transform_1, window_bounds = array<i64: 32, 8>}, {pipeline_mode = #tpu.pipeline_mode<synchronous>, transform_indices = @transform_2, window_bounds = array<i64: 32, 1>}, {pipeline_mode = #tpu.pipeline_mode<synchronous>, transform_indices = @transform_3, window_bounds = array<i64: 32, 32>}, {pipeline_mode = #tpu.pipeline_mode<synchronous>, transform_indices = @transform_4, window_bounds = array<i64: 32, 1>}, {pipeline_mode = #tpu.pipeline_mode<synchronous>, transform_indices = @transform_5, window_bounds = array<i64: 4, 32>}, {pipeline_mode = #tpu.pipeline_mode<synchronous>, transform_indices = @transform_6, window_bounds = array<i64: 4, 1>}, {transform_indices = @transform_7, window_bounds = array<i64: 4, 64>}]} {
    %c0 = arith.constant 0 : index
    %c0_0 = arith.constant 0 : index
    %0 = vector.load %arg1[%c0, %c0_0] : memref<8x64xf32, #tpu.memory_space<vmem>>, vector<8x64xf32>
    %c0_1 = arith.constant 0 : index
    %c0_2 = arith.constant 0 : index
    %1 = vector.load %arg2[%c0_1, %c0_2] : memref<32x8xf32, #tpu.memory_space<vmem>>, vector<32x8xf32>
    %c0_3 = arith.constant 0 : index
    %c0_4 = arith.constant 0 : index
    %2 = vector.load %arg3[%c0_3, %c0_4] : memref<32x1xf32, #tpu.memory_space<vmem>>, vector<32x1xf32>
    %cst = arith.constant dense<0.000000e+00> : vector<32x64xf32>
    %3 = tpu.matmul %1, %0, %cst {dimension_numbers = #tpu.dot_dimension_numbers<[1], [0], [0], [1], [0, 0, 1, 1], [], []>} : vector<32x8xf32>, vector<8x64xf32>, vector<32x64xf32> -> vector<32x64xf32>
    %4 = vector.broadcast %2 : vector<32x1xf32> to vector<32x64xf32>
    %5 = arith.addf %3, %4 : vector<32x64xf32>
    %cst_5 = arith.constant 0.000000e+00 : f32
    %6 = vector.broadcast %cst_5 : f32 to vector<32x64xf32>
    %7 = arith.maximumf %5, %6 : vector<32x64xf32>
    %c0_6 = arith.constant 0 : index
    %c0_7 = arith.constant 0 : index
    %8 = vector.load %arg4[%c0_6, %c0_7] : memref<32x32xf32, #tpu.memory_space<vmem>>, vector<32x32xf32>
    %c0_8 = arith.constant 0 : index
    %c0_9 = arith.constant 0 : index
    %9 = vector.load %arg5[%c0_8, %c0_9] : memref<32x1xf32, #tpu.memory_space<vmem>>, vector<32x1xf32>
    %cst_10 = arith.constant dense<0.000000e+00> : vector<32x64xf32>
    %10 = tpu.matmul %8, %7, %cst_10 {dimension_numbers = #tpu.dot_dimension_numbers<[1], [0], [0], [1], [0, 0, 1, 1], [], []>} : vector<32x32xf32>, vector<32x64xf32>, vector<32x64xf32> -> vector<32x64xf32>
    %11 = vector.broadcast %9 : vector<32x1xf32> to vector<32x64xf32>
    %12 = arith.addf %10, %11 : vector<32x64xf32>
    %cst_11 = arith.constant 0.000000e+00 : f32
    %13 = vector.broadcast %cst_11 : f32 to vector<32x64xf32>
    %14 = arith.maximumf %12, %13 : vector<32x64xf32>
    %c0_12 = arith.constant 0 : index
    %c0_13 = arith.constant 0 : index
    %15 = vector.load %arg6[%c0_12, %c0_13] : memref<4x32xf32, #tpu.memory_space<vmem>>, vector<4x32xf32>
    %c0_14 = arith.constant 0 : index
    %c0_15 = arith.constant 0 : index
    %16 = vector.load %arg7[%c0_14, %c0_15] : memref<4x1xf32, #tpu.memory_space<vmem>>, vector<4x1xf32>
    %cst_16 = arith.constant dense<0.000000e+00> : vector<4x64xf32>
    %17 = tpu.matmul %15, %14, %cst_16 {dimension_numbers = #tpu.dot_dimension_numbers<[1], [0], [0], [1], [0, 0, 1, 1], [], []>} : vector<4x32xf32>, vector<32x64xf32>, vector<4x64xf32> -> vector<4x64xf32>
    %18 = vector.broadcast %16 : vector<4x1xf32> to vector<4x64xf32>
    %19 = arith.addf %17, %18 : vector<4x64xf32>
    %c0_17 = arith.constant 0 : index
    %c0_18 = arith.constant 0 : index
    %20 = vector.load %arg8[%c0_17, %c0_18] : memref<4x64xf32, #tpu.memory_space<vmem>>, vector<4x64xf32>
    tpu.vector_store %arg8[%c0_17, %c0_18], %19 {strides = array<i32>} : memref<4x64xf32, #tpu.memory_space<vmem>>, vector<4x64xf32>,
    return
  }
  func.func @transform_0(%arg0: i32) -> (i32, i32) {
    %c0_i32 = arith.constant 0 : i32
    %c0_i32_0 = arith.constant 0 : i32
    return %c0_i32, %arg0 : i32, i32
  }
  func.func @transform_1(%arg0: i32) -> (i32, i32) {
    %c0_i32 = arith.constant 0 : i32
    %c0_i32_0 = arith.constant 0 : i32
    %c0_i32_1 = arith.constant 0 : i32
    return %c0_i32, %c0_i32_0 : i32, i32
  }
  func.func @transform_2(%arg0: i32) -> (i32, i32) {
    %c0_i32 = arith.constant 0 : i32
    %c0_i32_0 = arith.constant 0 : i32
    %c0_i32_1 = arith.constant 0 : i32
    return %c0_i32, %c0_i32_0 : i32, i32
  }
  func.func @transform_3(%arg0: i32) -> (i32, i32) {
    %c0_i32 = arith.constant 0 : i32
    %c0_i32_0 = arith.constant 0 : i32
    %c0_i32_1 = arith.constant 0 : i32
    return %c0_i32, %c0_i32_0 : i32, i32
  }
  func.func @transform_4(%arg0: i32) -> (i32, i32) {
    %c0_i32 = arith.constant 0 : i32
    %c0_i32_0 = arith.constant 0 : i32
    %c0_i32_1 = arith.constant 0 : i32
    return %c0_i32, %c0_i32_0 : i32, i32
  }
  func.func @transform_5(%arg0: i32) -> (i32, i32) {
    %c0_i32 = arith.constant 0 : i32
    %c0_i32_0 = arith.constant 0 : i32
    %c0_i32_1 = arith.constant 0 : i32
    return %c0_i32, %c0_i32_0 : i32, i32
  }
  func.func @transform_6(%arg0: i32) -> (i32, i32) {
    %c0_i32 = arith.constant 0 : i32
    %c0_i32_0 = arith.constant 0 : i32
    %c0_i32_1 = arith.constant 0 : i32
    return %c0_i32, %c0_i32_0 : i32, i32
  }
  func.func @transform_7(%arg0: i32) -> (i32, i32) {
    %c0_i32 = arith.constant 0 : i32
    %c0_i32_0 = arith.constant 0 : i32
    return %c0_i32, %arg0 : i32, i32
  }
}

module attributes {stable_mosaic.version = 11 : i64} {
  func.func @_mlp_kernel(%arg0: i32, %arg1: memref<8x64xf32, #tpu.memory_space<vmem>>, %arg2: memref<32x8xf32, #tpu.memory_space<vmem>>, %arg3: memref<32x1xf32, #tpu.memory_space<vmem>>, %arg4: memref<32x32xf32, #tpu.memory_space<vmem>>, %arg5: memref<32x1xf32, #tpu.memory_space<vmem>>, %arg6: memref<4x32xf32, #tpu.memory_space<vmem>>, %arg7: memref<4x1xf32, #tpu.memory_space<vmem>>, %arg8: memref<4x64xf32, #tpu.memory_space<vmem>>) attributes {dimension_semantics = [#tpu.dimension_semantics<parallel>], iteration_bounds = array<i64: 1>, scalar_prefetch = 0 : i64, scratch_operands = 0 : i64, tpu.core_type = #tpu.core_type<tc>, window_params = [{transform_indices = @transform_0, window_bounds = array<i64: 8, 64>}, {pipeline_mode = #tpu.pipeline_mode<synchronous>, transform_indices = @transform_1, window_bounds = array<i64: 32, 8>}, {pipeline_mode = #tpu.pipeline_mode<synchronous>, transform_indices = @transform_2, window_bounds = array<i64: 32, 1>}, {pipeline_mode = #tpu.pipeline_mode<synchronous>, transform_indices = @transform_3, window_bounds = array<i64: 32, 32>}, {pipeline_mode = #tpu.pipeline_mode<synchronous>, transform_indices = @transform_4, window_bounds = array<i64: 32, 1>}, {pipeline_mode = #tpu.pipeline_mode<synchronous>, transform_indices = @transform_5, window_bounds = array<i64: 4, 32>}, {pipeline_mode = #tpu.pipeline_mode<synchronous>, transform_indices = @transform_6, window_bounds = array<i64: 4, 1>}, {transform_indices = @transform_7, window_bounds = array<i64: 4, 64>}]} {
    %c0 = arith.constant 0 : index
    %c0_0 = arith.constant 0 : index
    %0 = vector.load %arg1[%c0, %c0_0] : memref<8x64xf32, #tpu.memory_space<vmem>>, vector<8x64xf32>
    %c0_1 = arith.constant 0 : index
    %c0_2 = arith.constant 0 : index
    %1 = vector.load %arg2[%c0_1, %c0_2] : memref<32x8xf32, #tpu.memory_space<vmem>>, vector<32x8xf32>
    %c0_3 = arith.constant 0 : index
    %c0_4 = arith.constant 0 : index
    %2 = vector.load %arg3[%c0_3, %c0_4] : memref<32x1xf32, #tpu.memory_space<vmem>>, vector<32x1xf32>
    %cst = arith.constant dense<0.000000e+00> : vector<32x64xf32>
    %3 = tpu.matmul %1, %0, %cst {dimension_numbers = #tpu.dot_dimension_numbers<[1], [0], [0], [1], [0, 0, 1, 1], [], []>} : vector<32x8xf32>, vector<8x64xf32>, vector<32x64xf32> -> vector<32x64xf32>
    %4 = vector.broadcast %2 : vector<32x1xf32> to vector<32x64xf32>
    %5 = arith.addf %3, %4 : vector<32x64xf32>
    %cst_5 = arith.constant 0.000000e+00 : f32
    %6 = vector.broadcast %cst_5 : f32 to vector<32x64xf32>
    %7 = arith.maximumf %5, %6 : vector<32x64xf32>
    %c0_6 = arith.constant 0 : index
    %c0_7 = arith.constant 0 : index
    %8 = vector.load %arg4[%c0_6, %c0_7] : memref<32x32xf32, #tpu.memory_space<vmem>>, vector<32x32xf32>
    %c0_8 = arith.constant 0 : index
    %c0_9 = arith.constant 0 : index
    %9 = vector.load %arg5[%c0_8, %c0_9] : memref<32x1xf32, #tpu.memory_space<vmem>>, vector<32x1xf32>
    %cst_10 = arith.constant dense<0.000000e+00> : vector<32x64xf32>
    %10 = tpu.matmul %8, %7, %cst_10 {dimension_numbers = #tpu.dot_dimension_numbers<[1], [0], [0], [1], [0, 0, 1, 1], [], []>} : vector<32x32xf32>, vector<32x64xf32>, vector<32x64xf32> -> vector<32x64xf32>
    %11 = vector.broadcast %9 : vector<32x1xf32> to vector<32x64xf32>
    %12 = arith.addf %10, %11 : vector<32x64xf32>
    %cst_11 = arith.constant 0.000000e+00 : f32
    %13 = vector.broadcast %cst_11 : f32 to vector<32x64xf32>
    %14 = arith.maximumf %12, %13 : vector<32x64xf32>
    %c0_12 = arith.constant 0 : index
    %c0_13 = arith.constant 0 : index
    %15 = vector.load %arg6[%c0_12, %c0_13] : memref<4x32xf32, #tpu.memory_space<vmem>>, vector<4x32xf32>
    %c0_14 = arith.constant 0 : index
    %c0_15 = arith.constant 0 : index
    %16 = vector.load %arg7[%c0_14, %c0_15] : memref<4x1xf32, #tpu.memory_space<vmem>>, vector<4x1xf32>
    %cst_16 = arith.constant dense<0.000000e+00> : vector<4x64xf32>
    %17 = tpu.matmul %15, %14, %cst_16 {dimension_numbers = #tpu.dot_dimension_numbers<[1], [0], [0], [1], [0, 0, 1, 1], [], []>} : vector<4x32xf32>, vector<32x64xf32>, vector<4x64xf32> -> vector<4x64xf32>
    %18 = vector.broadcast %16 : vector<4x1xf32> to vector<4x64xf32>
    %19 = arith.addf %17, %18 : vector<4x64xf32>
    %c0_17 = arith.constant 0 : index
    %c0_18 = arith.constant 0 : index
    %20 = vector.load %arg8[%c0_17, %c0_18] : memref<4x64xf32, #tpu.memory_space<vmem>>, vector<4x64xf32>
    tpu.vector_store %arg8[%c0_17, %c0_18], %19 {strides = array<i32>} : memref<4x64xf32, #tpu.memory_space<vmem>>, vector<4x64xf32>,
    return
  }
  func.func @transform_0(%arg0: i32) -> (i32, i32) {
    %c0_i32 = arith.constant 0 : i32
    %c0_i32_0 = arith.constant 0 : i32
    return %c0_i32, %arg0 : i32, i32
  }
  func.func @transform_1(%arg0: i32) -> (i32, i32) {
    %c0_i32 = arith.constant 0 : i32
    %c0_i32_0 = arith.constant 0 : i32
    %c0_i32_1 = arith.constant 0 : i32
    return %c0_i32, %c0_i32_0 : i32, i32
  }
  func.func @transform_2(%arg0: i32) -> (i32, i32) {
    %c0_i32 = arith.constant 0 : i32
    %c0_i32_0 = arith.constant 0 : i32
    %c0_i32_1 = arith.constant 0 : i32
    return %c0_i32, %c0_i32_0 : i32, i32
  }
  func.func @transform_3(%arg0: i32) -> (i32, i32) {
    %c0_i32 = arith.constant 0 : i32
    %c0_i32_0 = arith.constant 0 : i32
    %c0_i32_1 = arith.constant 0 : i32
    return %c0_i32, %c0_i32_0 : i32, i32
  }
  func.func @transform_4(%arg0: i32) -> (i32, i32) {
    %c0_i32 = arith.constant 0 : i32
    %c0_i32_0 = arith.constant 0 : i32
    %c0_i32_1 = arith.constant 0 : i32
    return %c0_i32, %c0_i32_0 : i32, i32
  }
  func.func @transform_5(%arg0: i32) -> (i32, i32) {
    %c0_i32 = arith.constant 0 : i32
    %c0_i32_0 = arith.constant 0 : i32
    %c0_i32_1 = arith.constant 0 : i32
    return %c0_i32, %c0_i32_0 : i32, i32
  }
  func.func @transform_6(%arg0: i32) -> (i32, i32) {
    %c0_i32 = arith.constant 0 : i32
    %c0_i32_0 = arith.constant 0 : i32
    %c0_i32_1 = arith.constant 0 : i32
    return %c0_i32, %c0_i32_0 : i32, i32
  }
  func.func @transform_7(%arg0: i32) -> (i32, i32) {
    %c0_i32 = arith.constant 0 : i32
    %c0_i32_0 = arith.constant 0 : i32
    return %c0_i32, %arg0 : i32, i32
  }
}

</mosaic_0001>

<bundles_post_ra>
// kernel: tpu_custom_call.1
= control target key start
LH: loop header
LB: loop body
LE: loop exit
PB: predicated region body
PF: predicated region fallthrough
CT: control target
= control target key end

     0   :  { %vm56_vm0 = vcmask 64512   ;;  %v489_v5 = vmov 0   ;;  %s612_s0 = inlined_call_operand.vmem [shape: f32[8,64], index: 0, kind: input, shape index: {}]   ;;  %s613_s1 = inlined_call_operand.vmem [shape: f32[32,8], index: 1, kind: input, shape index: {}]   ;;  %s614_s2 = inlined_call_operand.vmem [shape: f32[32,1], index: 2, kind: input, shape index: {}]   ;;  %s615_s3 = inlined_call_operand.vmem [shape: f32[32,32], index: 3, kind: input, shape index: {}]   ;;  %s616_s4 = inlined_call_operand.vmem [shape: f32[32,1], index: 4, kind: input, shape index: {}]   ;;  %s617_s5 = inlined_call_operand.vmem [shape: f32[4,32], index: 5, kind: input, shape index: {}]   ;;  %s618_s6 = inlined_call_operand.vmem [shape: f32[4,1], index: 6, kind: input, shape index: {}]   ;;  %s619_s7 = inlined_call_operand.hbm [shape: f32[4,64], index: 7, kind: output, shape index: {}]  }
   0x1   :  { %v27_v0 = vld [vmem:[%s612_s0] sm:$0xff]  ;;  %v29_v2 = vld [vmem:[%s613_s1 + $0x8] sm:$0xff]  ;;  %v30_v3 = vld [vmem:[%s613_s1 + $0x10] sm:$0xff]  ;;  %463 = vset.pattern.permute.xlu0 %v489_v5  ;;  %464 = vset.pattern.permute.xlu1 %v489_v5 }
   0x2   :  { %v28_v1 = vld [vmem:[%s613_s1] sm:$0xff]  ;;  %411 = vmatprep.subr.mxu0 %v27_v0  ;;  %v34_v6 = vld [vmem:[%s614_s2 + $0x10] sm:$0xff]  ;;  %v31_v7 = vld [vmem:[%s613_s1 + $0x18] sm:$0xff] }
   0x3   :  { %413 = vmatprep.mubr.msk.f32.mxu0 %vm56_vm0, %v28_v1  ;;  %v32_v4 = vld [vmem:[%s614_s2] sm:$0xff]  ;;  %412 = vmatpush3.msra.mxu0 %v27_v0  ;;  %v33_v8 = vld [vmem:[%s614_s2 + $0x8] sm:$0xff] }
   0x4   :  { %414 = vmatmul.mubr.msk.f32.vlgmr.msra.gmra.mrb[0].mxu0 %vm56_vm0, %v29_v2  ;;  %38 = vperm.xlu0 %463, %v32_v4  }
   0x5   :  { %416 = vmatprep.mubr.msk.f32.mxu0 %vm56_vm0, %v30_v3 }
   0x6   :  { %12 = vsyncpa [#allocation3], 0  ;;  %48 = vperm.xlu1 %464, %v34_v6   ;;  %v35_v9 = vld [vmem:[%s614_s2 + $0x18] sm:$0xff]  ;;  %v162_v10 = vld [vmem:[%s616_s4] sm:$0xff]  ;;  %vm186_vm1 = vcmask 261120   ;;  %v490_v37 = vmov 0.0|0.0  }
   0x7   :  { %v163_v11 = vld [vmem:[%s616_s4 + $0x8] sm:$0xff]  ;;  %v164_v12 = vld [vmem:[%s616_s4 + $0x10] sm:$0xff]  ;;  %v165_v13 = vld [vmem:[%s616_s4 + $0x18] sm:$0xff]  ;;  %452 = vmatprep.subr.bf16.mxu0 %v490_v37  ;;  %vm491_vm2 = vmmov 0   ;;  %v492_v38 = vmov 0.0   ;;  %s493_s10 = smov [#allocation2]  }
   0x8   :  { %417 = vmatmul.mubr.msk.f32.gmra.mrb[2].mxu0 %vm56_vm0, %v31_v7  ;;  %43 = vperm.xlu0 %463, %v33_v8   ;;  %v289_v14 = vld [vmem:[%s618_s6] sm:$0xf]  ;;  %v159_v34 = vld [vmem:[%s615_s3 + $0x8] sm:$0xff]  ;;  %v160_v35 = vld [vmem:[%s615_s3 + $0x10] sm:$0xff]  ;;  %s376_s0 = sshll.u32 %s493_s10, 4  ;;  %vm368_vm3 = vcmask 519168   ;;  %s377_s0 = int_to_ptr.vmem [resolvable:$true] %s376_s0 }
   0x9   :  { %v158_v15 = vld [vmem:[%s615_s3] sm:$0xff]  ;;  %v161_v36 = vld [vmem:[%s615_s3 + $0x18] sm:$0xff]  ;;  %441 = vmatprep.mubr.msk.f32.mxu0 %vm491_vm2, %v492_v38  ;;  %s465_s11 = scalar_lea.vmem %s377_s0, 64  ;;  %p470_p1 = scmp.lt.s32.totalorder %s377_s0, %s377_s0 }
   0xa   :  { %53 = vperm.xlu1 %464, %v35_v9   ;;  %427 = vmatprep.mubr.msk.f32.mxu1 %vm186_vm1, %v158_v15  ;;  %v288_v57 = vld [vmem:[%s617_s5] sm:$0xf]  ;;  %p466_p0 = scmp.ne.s32.totalorder %s377_s0, %s465_s11  ;;  %p471_p2 = scmp.lt.s32.totalorder %s465_s11, %s465_s11 }
   0xc   :  { %168 = vperm.xlu0 %463, %v162_v10   ;;  %p472_p3 = por %p471_p2, %p470_p1 }
   0xe   :  { %173 = vperm.xlu1 %464, %v163_v11   ;;  %p473_p4 = pnand %p472_p3, %p466_p0 }
  0x10   :  { %178 = vperm.xlu0 %463, %v164_v12  }
  0x12   :  { %183 = vperm.xlu1 %464, %v165_v13  }
  0x14   :  { %292 = vperm.xlu0 %463, %v289_v14  }
  0x83   :  { %v39_v16 = vpop.permute.xlu0 %38 }
  0x85   :  { %v49_v17 = vpop.permute.xlu1 %48 }
  0x87   :  { %v44_v18 = vpop.permute.xlu0 %43 }
  0x89   :  { %v54_v24 = vpop.permute.xlu1 %53 }
  0x8b   :  { %v169_v40 = vpop.permute.xlu0 %168 }
  0x8d   :  { %v174_v39 = vpop.permute.xlu1 %173 }
  0x8f   :  { %v179_v49 = vpop.permute.xlu0 %178 }
  0x91   :  { %v184_v46 = vpop.permute.xlu1 %183 }
  0x93   :  { %v293_v58 = vpop.permute.xlu0 %292 }
  0xd7   :  { %v415_v19 = vpop.f32.mrb[0].mxu0 }
  0xd8   :  { %v141_v20 = vadd.f32 %v415_v19, %v44_v18  ;;  %v135_v21 = vpop.f32.mrb[1].mxu0 }
  0xd9   :  { %v136_v22 = vadd.f32 %v135_v21, %v39_v16 }
  0xda   :  { %v155_v23 = vmax.f32 %v141_v20, 0.0 }
  0xdb   :  { %v154_v25 = vmax.f32 %v136_v22, 0.0  ;;  %v418_v26 = vpop.f32.mrb[2].mxu0 }
  0xdc   :  { %v151_v27 = vadd.f32 %v418_v26, %v54_v24  ;;  %v145_v28 = vpop.f32.mrb[3].mxu0 }
  0xdd   :  { %v146_v29 = vadd.f32 %v145_v28, %v49_v17  ;;  %v444_v30 = vpack.c.bf16 %v155_v23, %v154_v25 }
  0xde   :  { %v157_v31 = vmax.f32 %v151_v27, 0.0 }
  0xdf   :  { %v156_v32 = vmax.f32 %v146_v29, 0.0  ;;  %445 = vmatprep.subr.bf16.mxu1 %v444_v30 }
  0xe0   :  { %447 = vmatpush3.bf16.msra.mxu1 %v444_v30 }
  0xe1   :  { %v448_v33 = vpack.c.bf16 %v157_v31, %v156_v32 }
  0xe3   :  { %449 = vmatprep.subr.bf16.mxu1 %v448_v33 }
  0xe4   :  { %451 = vmatpush3.bf16.msra.mxu1 %v448_v33 }
  0xe7   :  { %428 = vmatmul.mubr.msk.f32.vlgmr.msra.gmra.mrb[0].mxu1 %vm186_vm1, %v159_v34 }
  0xe8   :  { %430 = vmatprep.mubr.msk.f32.mxu1 %vm186_vm1, %v160_v35 }
  0xeb   :  { %431 = vmatmul.mubr.msk.f32.gmra.mrb[2].mxu1 %vm186_vm1, %v161_v36 }
 0x1ba   :  { %v429_v41 = vpop.f32.mrb[0].mxu1 }
 0x1bb   :  { %v271_v42 = vadd.f32 %v429_v41, %v174_v39  ;;  %v265_v43 = vpop.f32.mrb[1].mxu1 }
 0x1bc   :  { %v266_v44 = vadd.f32 %v265_v43, %v169_v40 }
 0x1bd   :  { %v285_v45 = vmax.f32 %v271_v42, 0.0 }
 0x1be   :  { %v284_v47 = vmax.f32 %v266_v44, 0.0  ;;  %v432_v48 = vpop.f32.mrb[2].mxu1 }
 0x1bf   :  { %v281_v50 = vadd.f32 %v432_v48, %v184_v46  ;;  %v275_v51 = vpop.f32.mrb[3].mxu1 }
 0x1c0   :  { %v453_v52 = vpack.c.bf16 %v285_v45, %v284_v47  ;;  %v276_v53 = vadd.f32 %v275_v51, %v179_v49 }
 0x1c1   :  { %v287_v54 = vmax.f32 %v281_v50, 0.0 }
 0x1c2   :  { %v286_v55 = vmax.f32 %v276_v53, 0.0  ;;  %454 = vmatpush3.bf16.msra.mxu0 %v453_v52 }
 0x1c3   :  { %455 = vmatprep.subr.bf16.mxu0 %v490_v37 }
 0x1c4   :  { %v456_v56 = vpack.c.bf16 %v287_v54, %v286_v55 }
 0x1c6   :  { %457 = vmatpush3.bf16.msra.mxu0 %v456_v56 }
 0x1c9   :  { %442 = vmatmul.mubr.msk.f32.vlgmr.msra.gmra.mrb[4].mxu0 %vm186_vm1, %v288_v57 }
 0x29c   :  { %v364_v59 = vpop.f32.mrb[4].mxu0 }
 0x29d   :  { %v365_v60 = vadd.f32 %v364_v59, %v293_v58  ;;  %v443_v61 = vpop.f32.mrb[5].mxu0 }
 0x29f   :  { %369 = vst.msk [vmem:[#allocation2] sm:$0xf] %vm368_vm3, %v365_v60 }
 0x2a0   :  { %476 = shalt.err (!%p473_p4)
}
 0x2a1   :  { %s477_s13 = scalar_lea.hbm %s619_s7, 64 }
 0x2a2   :  { %p478_p5 = scmp.ne.s32.totalorder %s619_s7, %s477_s13  ;;  %p481_p6 = scmp.lt.u32.totalorder %s477_s13, %s619_s7 }
 0x2a4   :  { %p483_p7 = pnand %p481_p6, %p478_p5 }
 0x2a6   :  { %486 = shalt.err (!%p483_p7)
}
 0x2a7   :  { %379 = dma.vmem_to_hbm [thread:$0]  %s377_s0, 64, %s619_s7, [#allocation3]  }
 0x2a8   :  { %487 = dma.done.wait [#allocation3], 64  }
 0x2a9   :  { %488 = vsyncadd [#allocation3], 4294967232 }
 0x2aa   :  { %383 = vsyncpa [#allocation3], 1 }

// kernel: tpu_custom_call.1
= control target key start
LH: loop header
LB: loop body
LE: loop exit
PB: predicated region body
PF: predicated region fallthrough
CT: control target
= control target key end

     0   :  { %vm56_vm0 = vcmask 64512   ;;  %v489_v5 = vmov 0   ;;  %s612_s0 = inlined_call_operand.vmem [shape: f32[8,64], index: 0, kind: input, shape index: {}]   ;;  %s613_s1 = inlined_call_operand.vmem [shape: f32[32,8], index: 1, kind: input, shape index: {}]   ;;  %s614_s2 = inlined_call_operand.vmem [shape: f32[32,1], index: 2, kind: input, shape index: {}]   ;;  %s615_s3 = inlined_call_operand.vmem [shape: f32[32,32], index: 3, kind: input, shape index: {}]   ;;  %s616_s4 = inlined_call_operand.vmem [shape: f32[32,1], index: 4, kind: input, shape index: {}]   ;;  %s617_s5 = inlined_call_operand.vmem [shape: f32[4,32], index: 5, kind: input, shape index: {}]   ;;  %s618_s6 = inlined_call_operand.vmem [shape: f32[4,1], index: 6, kind: input, shape index: {}]   ;;  %s619_s7 = inlined_call_operand.hbm [shape: f32[4,64], index: 7, kind: output, shape index: {}]  }
   0x1   :  { %v27_v0 = vld [vmem:[%s612_s0] sm:$0xff]  ;;  %v29_v2 = vld [vmem:[%s613_s1 + $0x8] sm:$0xff]  ;;  %v30_v3 = vld [vmem:[%s613_s1 + $0x10] sm:$0xff]  ;;  %463 = vset.pattern.permute.xlu0 %v489_v5  ;;  %464 = vset.pattern.permute.xlu1 %v489_v5 }
   0x2   :  { %v28_v1 = vld [vmem:[%s613_s1] sm:$0xff]  ;;  %411 = vmatprep.subr.mxu0 %v27_v0  ;;  %v34_v6 = vld [vmem:[%s614_s2 + $0x10] sm:$0xff]  ;;  %v31_v7 = vld [vmem:[%s613_s1 + $0x18] sm:$0xff] }
   0x3   :  { %413 = vmatprep.mubr.msk.f32.mxu0 %vm56_vm0, %v28_v1  ;;  %v32_v4 = vld [vmem:[%s614_s2] sm:$0xff]  ;;  %412 = vmatpush3.msra.mxu0 %v27_v0  ;;  %v33_v8 = vld [vmem:[%s614_s2 + $0x8] sm:$0xff] }
   0x4   :  { %414 = vmatmul.mubr.msk.f32.vlgmr.msra.gmra.mrb[0].mxu0 %vm56_vm0, %v29_v2  ;;  %38 = vperm.xlu0 %463, %v32_v4  }
   0x5   :  { %416 = vmatprep.mubr.msk.f32.mxu0 %vm56_vm0, %v30_v3 }
   0x6   :  { %12 = vsyncpa [#allocation3], 0  ;;  %48 = vperm.xlu1 %464, %v34_v6   ;;  %v35_v9 = vld [vmem:[%s614_s2 + $0x18] sm:$0xff]  ;;  %v162_v10 = vld [vmem:[%s616_s4] sm:$0xff]  ;;  %vm186_vm1 = vcmask 261120   ;;  %v490_v37 = vmov 0.0|0.0  }
   0x7   :  { %v163_v11 = vld [vmem:[%s616_s4 + $0x8] sm:$0xff]  ;;  %v164_v12 = vld [vmem:[%s616_s4 + $0x10] sm:$0xff]  ;;  %v165_v13 = vld [vmem:[%s616_s4 + $0x18] sm:$0xff]  ;;  %452 = vmatprep.subr.bf16.mxu0 %v490_v37  ;;  %vm491_vm2 = vmmov 0   ;;  %v492_v38 = vmov 0.0   ;;  %s493_s10 = smov [#allocation2]  }
   0x8   :  { %417 = vmatmul.mubr.msk.f32.gmra.mrb[2].mxu0 %vm56_vm0, %v31_v7  ;;  %43 = vperm.xlu0 %463, %v33_v8   ;;  %v289_v14 = vld [vmem:[%s618_s6] sm:$0xf]  ;;  %v159_v34 = vld [vmem:[%s615_s3 + $0x8] sm:$0xff]  ;;  %v160_v35 = vld [vmem:[%s615_s3 + $0x10] sm:$0xff]  ;;  %s376_s0 = sshll.u32 %s493_s10, 4  ;;  %vm368_vm3 = vcmask 519168   ;;  %s377_s0 = int_to_ptr.vmem [resolvable:$true] %s376_s0 }
   0x9   :  { %v158_v15 = vld [vmem:[%s615_s3] sm:$0xff]  ;;  %v161_v36 = vld [vmem:[%s615_s3 + $0x18] sm:$0xff]  ;;  %441 = vmatprep.mubr.msk.f32.mxu0 %vm491_vm2, %v492_v38  ;;  %s465_s11 = scalar_lea.vmem %s377_s0, 64  ;;  %p470_p1 = scmp.lt.s32.totalorder %s377_s0, %s377_s0 }
   0xa   :  { %53 = vperm.xlu1 %464, %v35_v9   ;;  %427 = vmatprep.mubr.msk.f32.mxu1 %vm186_vm1, %v158_v15  ;;  %v288_v57 = vld [vmem:[%s617_s5] sm:$0xf]  ;;  %p466_p0 = scmp.ne.s32.totalorder %s377_s0, %s465_s11  ;;  %p471_p2 = scmp.lt.s32.totalorder %s465_s11, %s465_s11 }
   0xc   :  { %168 = vperm.xlu0 %463, %v162_v10   ;;  %p472_p3 = por %p471_p2, %p470_p1 }
   0xe   :  { %173 = vperm.xlu1 %464, %v163_v11   ;;  %p473_p4 = pnand %p472_p3, %p466_p0 }
  0x10   :  { %178 = vperm.xlu0 %463, %v164_v12  }
  0x12   :  { %183 = vperm.xlu1 %464, %v165_v13  }
  0x14   :  { %292 = vperm.xlu0 %463, %v289_v14  }
  0x83   :  { %v39_v16 = vpop.permute.xlu0 %38 }
  0x85   :  { %v49_v17 = vpop.permute.xlu1 %48 }
  0x87   :  { %v44_v18 = vpop.permute.xlu0 %43 }
  0x89   :  { %v54_v24 = vpop.permute.xlu1 %53 }
  0x8b   :  { %v169_v40 = vpop.permute.xlu0 %168 }
  0x8d   :  { %v174_v39 = vpop.permute.xlu1 %173 }
  0x8f   :  { %v179_v49 = vpop.permute.xlu0 %178 }
  0x91   :  { %v184_v46 = vpop.permute.xlu1 %183 }
  0x93   :  { %v293_v58 = vpop.permute.xlu0 %292 }
  0xd7   :  { %v415_v19 = vpop.f32.mrb[0].mxu0 }
  0xd8   :  { %v141_v20 = vadd.f32 %v415_v19, %v44_v18  ;;  %v135_v21 = vpop.f32.mrb[1].mxu0 }
  0xd9   :  { %v136_v22 = vadd.f32 %v135_v21, %v39_v16 }
  0xda   :  { %v155_v23 = vmax.f32 %v141_v20, 0.0 }
  0xdb   :  { %v154_v25 = vmax.f32 %v136_v22, 0.0  ;;  %v418_v26 = vpop.f32.mrb[2].mxu0 }
  0xdc   :  { %v151_v27 = vadd.f32 %v418_v26, %v54_v24  ;;  %v145_v28 = vpop.f32.mrb[3].mxu0 }
  0xdd   :  { %v146_v29 = vadd.f32 %v145_v28, %v49_v17  ;;  %v444_v30 = vpack.c.bf16 %v155_v23, %v154_v25 }
  0xde   :  { %v157_v31 = vmax.f32 %v151_v27, 0.0 }
  0xdf   :  { %v156_v32 = vmax.f32 %v146_v29, 0.0  ;;  %445 = vmatprep.subr.bf16.mxu1 %v444_v30 }
  0xe0   :  { %447 = vmatpush3.bf16.msra.mxu1 %v444_v30 }
  0xe1   :  { %v448_v33 = vpack.c.bf16 %v157_v31, %v156_v32 }
  0xe3   :  { %449 = vmatprep.subr.bf16.mxu1 %v448_v33 }
  0xe4   :  { %451 = vmatpush3.bf16.msra.mxu1 %v448_v33 }
  0xe7   :  { %428 = vmatmul.mubr.msk.f32.vlgmr.msra.gmra.mrb[0].mxu1 %vm186_vm1, %v159_v34 }
  0xe8   :  { %430 = vmatprep.mubr.msk.f32.mxu1 %vm186_vm1, %v160_v35 }
  0xeb   :  { %431 = vmatmul.mubr.msk.f32.gmra.mrb[2].mxu1 %vm186_vm1, %v161_v36 }
 0x1ba   :  { %v429_v41 = vpop.f32.mrb[0].mxu1 }
 0x1bb   :  { %v271_v42 = vadd.f32 %v429_v41, %v174_v39  ;;  %v265_v43 = vpop.f32.mrb[1].mxu1 }
 0x1bc   :  { %v266_v44 = vadd.f32 %v265_v43, %v169_v40 }
 0x1bd   :  { %v285_v45 = vmax.f32 %v271_v42, 0.0 }
 0x1be   :  { %v284_v47 = vmax.f32 %v266_v44, 0.0  ;;  %v432_v48 = vpop.f32.mrb[2].mxu1 }
 0x1bf   :  { %v281_v50 = vadd.f32 %v432_v48, %v184_v46  ;;  %v275_v51 = vpop.f32.mrb[3].mxu1 }
 0x1c0   :  { %v453_v52 = vpack.c.bf16 %v285_v45, %v284_v47  ;;  %v276_v53 = vadd.f32 %v275_v51, %v179_v49 }
 0x1c1   :  { %v287_v54 = vmax.f32 %v281_v50, 0.0 }
 0x1c2   :  { %v286_v55 = vmax.f32 %v276_v53, 0.0  ;;  %454 = vmatpush3.bf16.msra.mxu0 %v453_v52 }
 0x1c3   :  { %455 = vmatprep.subr.bf16.mxu0 %v490_v37 }
 0x1c4   :  { %v456_v56 = vpack.c.bf16 %v287_v54, %v286_v55 }
 0x1c6   :  { %457 = vmatpush3.bf16.msra.mxu0 %v456_v56 }
 0x1c9   :  { %442 = vmatmul.mubr.msk.f32.vlgmr.msra.gmra.mrb[4].mxu0 %vm186_vm1, %v288_v57 }
 0x29c   :  { %v364_v59 = vpop.f32.mrb[4].mxu0 }
 0x29d   :  { %v365_v60 = vadd.f32 %v364_v59, %v293_v58  ;;  %v443_v61 = vpop.f32.mrb[5].mxu0 }
 0x29f   :  { %369 = vst.msk [vmem:[#allocation2] sm:$0xf] %vm368_vm3, %v365_v60 }
 0x2a0   :  { %476 = shalt.err (!%p473_p4)
}
 0x2a1   :  { %s477_s13 = scalar_lea.hbm %s619_s7, 64 }
 0x2a2   :  { %p478_p5 = scmp.ne.s32.totalorder %s619_s7, %s477_s13  ;;  %p481_p6 = scmp.lt.u32.totalorder %s477_s13, %s619_s7 }
 0x2a4   :  { %p483_p7 = pnand %p481_p6, %p478_p5 }
 0x2a6   :  { %486 = shalt.err (!%p483_p7)
}
 0x2a7   :  { %379 = dma.vmem_to_hbm [thread:$0]  %s377_s0, 64, %s619_s7, [#allocation3]  }
 0x2a8   :  { %487 = dma.done.wait [#allocation3], 64  }
 0x2a9   :  { %488 = vsyncadd [#allocation3], 4294967232 }
 0x2aa   :  { %383 = vsyncpa [#allocation3], 1 }

</bundles_post_ra>
